<compile_context>
chip_gen: v7x
topology: tpu7x:2x2x1
jax: 0.10.0
libtpu: 0.0.40
codegen_flags: <defaults>
</compile_context>

<pallas_src>
import jax
import jax.numpy as jnp
from jax.experimental import pallas as pl
from jax.experimental.pallas import tpu as pltpu

# ---------------- model hyper-parameters (small, consistent with __init__) ---
TASK_EMB = 32       # task_embedding_size
STATE_SIZE = 4      # state_size
STATE_EMB = 16      # state_embed_size
ACTION_SIZE = 2     # action_size
ACTION_EMB = 8      # action_embed_size
LAYERS = (64, 32)   # layers
BATCH = 8

# packed-activation lane offsets: [task | next_state | prev_state | action | 0...]
_OFF_TASK = 0
_OFF_NS = _OFF_TASK + TASK_EMB          # 32
_OFF_PS = _OFF_NS + STATE_SIZE          # 36
_OFF_ACT = _OFF_PS + STATE_SIZE         # 40
_FEAT = _OFF_ACT + ACTION_SIZE          # 42 (padded to 128 lanes)
LANES = 128


def _relu(x):
    return jnp.maximum(x, 0.0)


def _round_up(n, m):
    return ((n + m - 1) // m) * m


# ----------------------------------------------------------------------------
# Kernel: 5 lane-dense (bm,128)@(128,128) matmuls, everything stays in VMEM.
#   w_ref[0] : fused encoder (block-diagonal ws/ws/wa)   -> h_enc = [hns|hps|ha|0]
#   w_ref[1] : fc_layers[0] block acting on raw x (task rows only)
#   w_ref[2] : fc_layers[0] block acting on h_enc (hns/hps/ha rows)
#   w_ref[3] : fc_layers[1]
#   w_ref[4] : fc_out (column 0 only; other output lanes are zero)
# ----------------------------------------------------------------------------
def reward_decoder_kernel(x_ref, w_ref, b_ref, o_ref):
    f32 = jnp.float32
    x = x_ref[...]

    # fused state/state/action encoders: one matmul + one bias + one relu
    h_enc = _relu(jnp.dot(x, w_ref[0], preferred_element_type=f32) + b_ref[0:1, :])

    # fc_layers[0] over cat((task, hns, ha, hps)) == sum of block matmuls
    h = _relu(
        jnp.dot(x, w_ref[1], preferred_element_type=f32)
        + jnp.dot(h_enc, w_ref[2], preferred_element_type=f32)
        + b_ref[1:2, :]
    )

    # fc_layers[1]
    h = _relu(jnp.dot(h, w_ref[3], preferred_element_type=f32) + b_ref[2:3, :])

    # fc_out (deterministic -> scalar in lane 0; lanes 1..127 are zero)
    o_ref[...] = jnp.dot(h, w_ref[4], preferred_element_type=f32) + b_ref[3:4, :]


# ----------------------------------------------------------------------------
# Host-side packing
# ----------------------------------------------------------------------------
def pack_params(params):
    """Pack the 13 per-layer tensors into one weight slab and one bias slab."""
    ws, bs, wa, ba, w0t, w0ns, w0a, w0ps, b0, w1, b1, wo, bo = params

    w = jnp.zeros((5, LANES, LANES), jnp.float32)
    # block 0: fused encoders (input = packed x, output = [hns(0:16)|hps(16:32)|ha(32:40)])
    w = w.at[0, _OFF_NS:_OFF_NS + STATE_SIZE, 0:STATE_EMB].set(ws)
    w = w.at[0, _OFF_PS:_OFF_PS + STATE_SIZE, STATE_EMB:2 * STATE_EMB].set(ws)
    w = w.at[0, _OFF_ACT:_OFF_ACT + ACTION_SIZE, 2 * STATE_EMB:2 * STATE_EMB + ACTION_EMB].set(wa)
    # block 1: fc_layers[0], task part (acts on raw packed x; non-task rows stay zero)
    w = w.at[1, 0:TASK_EMB, 0:LAYERS[0]].set(w0t)
    # block 2: fc_layers[0], encoded part (acts on h_enc laid out as [hns|hps|ha])
    w = w.at[2, 0:STATE_EMB, 0:LAYERS[0]].set(w0ns)
    w = w.at[2, STATE_EMB:2 * STATE_EMB, 0:LAYERS[0]].set(w0ps)
    w = w.at[2, 2 * STATE_EMB:2 * STATE_EMB + ACTION_EMB, 0:LAYERS[0]].set(w0a)
    # block 3: fc_layers[1]
    w = w.at[3, 0:LAYERS[0], 0:LAYERS[1]].set(w1)
    # block 4: fc_out
    w = w.at[4, 0:LAYERS[1], 0:1].set(wo)

    b = jnp.zeros((8, LANES), jnp.float32)
    b = b.at[0, 0:STATE_EMB].set(bs[0])
    b = b.at[0, STATE_EMB:2 * STATE_EMB].set(bs[0])
    b = b.at[0, 2 * STATE_EMB:2 * STATE_EMB + ACTION_EMB].set(ba[0])
    b = b.at[1, 0:LAYERS[0]].set(b0[0])
    b = b.at[2, 0:LAYERS[1]].set(b1[0])
    b = b.at[3, 0:1].set(bo[0])
    return w, b


def pack_inputs(task_embedding, next_state, prev_state, action, rows):
    """One pre-concatenated, lane-dense (rows, 128) activation slab."""
    bsz = task_embedding.shape[0]
    feat = jnp.concatenate(
        [task_embedding, next_state, prev_state, action], axis=-1
    ).astype(jnp.float32)                                     # (bsz, 42)
    x = jnp.zeros((rows, LANES), jnp.float32)
    return x.at[:bsz, :feat.shape[1]].set(feat)


def make_reward_decoder(params, *, block_rows=256):
    """Pack weights once; return a jitted forward(task, next_state, prev_state, action)."""
    w_slab, b_slab = pack_params(params)

    def forward(task_embedding, next_state, prev_state, action):
        bsz = task_embedding.shape[0]
        bp8 = _round_up(bsz, 8)
        bm = bp8 if bp8 <= block_rows else block_rows          # batch tile (multiple of 8)
        rows = _round_up(bp8, bm)                              # padded batch

        x = pack_inputs(task_embedding, next_state, prev_state, action, rows)

        out = pl.pallas_call(
            reward_decoder_kernel,
            out_shape=jax.ShapeDtypeStruct((rows, LANES), jnp.float32),
            grid=(rows // bm,),
            in_specs=[
                pl.BlockSpec((bm, LANES), lambda i: (i, 0)),          # activations: tiled
                pl.BlockSpec((5, LANES, LANES), lambda i: (0, 0, 0)),  # weights: resident
                pl.BlockSpec((8, LANES), lambda i: (0, 0)),            # biases: resident
            ],
            out_specs=pl.BlockSpec((bm, LANES), lambda i: (i, 0)),
            compiler_params=pltpu.CompilerParams(
                dimension_semantics=("parallel",)),                    # megacore on v7x
        )(x, w_slab, b_slab)

        return out[:bsz, 0:1]

    return jax.jit(forward)


# ----------------------------------------------------------------------------
# Parameter init + pure-JAX reference (identical to the PyTorch forward)
# ----------------------------------------------------------------------------
def init_params(key):
    ks = jax.random.split(key, 9)

    def lin(k, fan_in, fan_out):
        kw, kb = jax.random.split(k)
        bound = 1.0 / jnp.sqrt(fan_in)
        wm = jax.random.uniform(kw, (fan_in, fan_out), jnp.float32, -bound, bound)
        bv = jax.random.uniform(kb, (1, fan_out), jnp.float32, -bound, bound)
        return wm, bv

    ws, bs = lin(ks[0], STATE_SIZE, STATE_EMB)        # state_encoder (shared next/prev)
    wa, ba = lin(ks[1], ACTION_SIZE, ACTION_EMB)      # action_encoder

    in0 = TASK_EMB + STATE_EMB + ACTION_EMB + STATE_EMB
    w0, b0 = lin(ks[2], in0, LAYERS[0])               # fc_layers[0]
    o = 0
    w0t = w0[o:o + TASK_EMB]; o += TASK_EMB           # concat order: task, hns, ha, hps
    w0ns = w0[o:o + STATE_EMB]; o += STATE_EMB
    w0a = w0[o:o + ACTION_EMB]; o += ACTION_EMB
    w0ps = w0[o:o + STATE_EMB]; o += STATE_EMB

    w1, b1 = lin(ks[3], LAYERS[0], LAYERS[1])         # fc_layers[1]
    wo, bo = lin(ks[4], LAYERS[1], 1)                 # fc_out (deterministic)

    return (ws, bs, wa, ba, w0t, w0ns, w0a, w0ps, b0, w1, b1, wo, bo)


def reference_forward(task_embedding, next_state, prev_state, action, params):
    ws, bs, wa, ba, w0t, w0ns, w0a, w0ps, b0, w1, b1, wo, bo = params
    hns = _relu(next_state @ ws + bs)
    ha = _relu(action @ wa + ba)
    hps = _relu(prev_state @ ws + bs)
    h = jnp.concatenate([task_embedding, hns, ha, hps], axis=-1)
    w0 = jnp.concatenate([w0t, w0ns, w0a, w0ps], axis=0)
    h = _relu(h @ w0 + b0)
    h = _relu(h @ w1 + b1)
    return h @ wo + bo


if __name__ == "__main__":
    key = jax.random.PRNGKey(0)
    k_task, k_ns, k_ps, k_a, k_p, k_big = jax.random.split(key, 6)

    params = init_params(k_p)
    decoder = make_reward_decoder(params)

    # --- small batch (grid of 1) ---
    task_embedding = jax.random.normal(k_task, (BATCH, TASK_EMB), jnp.float32)
    next_state = jax.random.normal(k_ns, (BATCH, STATE_SIZE), jnp.float32)
    prev_state = jax.random.normal(k_ps, (BATCH, STATE_SIZE), jnp.float32)
    action = jax.random.normal(k_a, (BATCH, ACTION_SIZE), jnp.float32)

    out = jax.block_until_ready(decoder(task_embedding, next_state, prev_state, action))
    ref = reference_forward(task_embedding, next_state, prev_state, action, params)
    assert out.shape == (BATCH, 1)
    assert jnp.allclose(out, ref, atol=1e-4, rtol=1e-4), "small-batch mismatch vs reference"

    # --- larger, non-multiple-of-tile batch exercising the parallel grid path ---
    BIG = 300
    kt, kn, kp2, ka = jax.random.split(k_big, 4)
    task_b = jax.random.normal(kt, (BIG, TASK_EMB), jnp.float32)
    ns_b = jax.random.normal(kn, (BIG, STATE_SIZE), jnp.float32)
    ps_b = jax.random.normal(kp2, (BIG, STATE_SIZE), jnp.float32)
    act_b = jax.random.normal(ka, (BIG, ACTION_SIZE), jnp.float32)

    out_b = jax.block_until_ready(decoder(task_b, ns_b, ps_b, act_b))
    ref_b = reference_forward(task_b, ns_b, ps_b, act_b, params)
    assert out_b.shape == (BIG, 1)
    assert jnp.allclose(out_b, ref_b, atol=1e-4, rtol=1e-4), "batched mismatch vs reference"

    print("KERNEL_OK")
</pallas_src>

<mosaic_0001>
module attributes {stable_mosaic.version = 11 : i64} {
  func.func @reward_decoder_kernel(%arg0: i32, %arg1: memref<8x128xf32, #tpu.memory_space<vmem>>, %arg2: memref<5x128x128xf32, #tpu.memory_space<vmem>>, %arg3: memref<8x128xf32, #tpu.memory_space<vmem>>, %arg4: memref<8x128xf32, #tpu.memory_space<vmem>>) attributes {dimension_semantics = [#tpu.dimension_semantics<parallel>], iteration_bounds = array<i64: 1>, scalar_prefetch = 0 : i64, scratch_operands = 0 : i64, tpu.core_type = #tpu.core_type<tc>, window_params = [{transform_indices = @transform_0, window_bounds = array<i64: 8, 128>}, {pipeline_mode = #tpu.pipeline_mode<synchronous>, transform_indices = @transform_1, window_bounds = array<i64: 5, 128, 128>}, {pipeline_mode = #tpu.pipeline_mode<synchronous>, transform_indices = @transform_2, window_bounds = array<i64: 8, 128>}, {transform_indices = @transform_3, window_bounds = array<i64: 8, 128>}]} {
    %c0 = arith.constant 0 : index
    %c0_0 = arith.constant 0 : index
    %0 = vector.load %arg1[%c0, %c0_0] : memref<8x128xf32, #tpu.memory_space<vmem>>, vector<8x128xf32>
    %c0_1 = arith.constant 0 : index
    %c0_2 = arith.constant 0 : index
    %c0_3 = arith.constant 0 : index
    %1 = vector.load %arg2[%c0_1, %c0_2, %c0_3] : memref<5x128x128xf32, #tpu.memory_space<vmem>>, vector<1x128x128xf32>
    %2 = vector.shape_cast %1 : vector<1x128x128xf32> to vector<128x128xf32>
    %cst = arith.constant dense<0.000000e+00> : vector<8x128xf32>
    %3 = tpu.matmul %0, %2, %cst {dimension_numbers = #tpu.dot_dimension_numbers<[1], [0], [0], [1], [0, 0, 1, 1], [], []>} : vector<8x128xf32>, vector<128x128xf32>, vector<8x128xf32> -> vector<8x128xf32>
    %c0_4 = arith.constant 0 : index
    %c0_5 = arith.constant 0 : index
    %4 = vector.load %arg3[%c0_4, %c0_5] : memref<8x128xf32, #tpu.memory_space<vmem>>, vector<1x128xf32>
    %5 = vector.broadcast %4 : vector<1x128xf32> to vector<8x128xf32>
    %6 = arith.addf %3, %5 : vector<8x128xf32>
    %cst_6 = arith.constant 0.000000e+00 : f32
    %7 = vector.broadcast %cst_6 : f32 to vector<8x128xf32>
    %8 = arith.maximumf %6, %7 : vector<8x128xf32>
    %c1 = arith.constant 1 : index
    %c0_7 = arith.constant 0 : index
    %c0_8 = arith.constant 0 : index
    %9 = vector.load %arg2[%c1, %c0_7, %c0_8] : memref<5x128x128xf32, #tpu.memory_space<vmem>>, vector<1x128x128xf32>
    %10 = vector.shape_cast %9 : vector<1x128x128xf32> to vector<128x128xf32>
    %cst_9 = arith.constant dense<0.000000e+00> : vector<8x128xf32>
    %11 = tpu.matmul %0, %10, %cst_9 {dimension_numbers = #tpu.dot_dimension_numbers<[1], [0], [0], [1], [0, 0, 1, 1], [], []>} : vector<8x128xf32>, vector<128x128xf32>, vector<8x128xf32> -> vector<8x128xf32>
    %c2 = arith.constant 2 : index
    %c0_10 = arith.constant 0 : index
    %c0_11 = arith.constant 0 : index
    %12 = vector.load %arg2[%c2, %c0_10, %c0_11] : memref<5x128x128xf32, #tpu.memory_space<vmem>>, vector<1x128x128xf32>
    %13 = vector.shape_cast %12 : vector<1x128x128xf32> to vector<128x128xf32>
    %cst_12 = arith.constant dense<0.000000e+00> : vector<8x128xf32>
    %14 = tpu.matmul %8, %13, %cst_12 {dimension_numbers = #tpu.dot_dimension_numbers<[1], [0], [0], [1], [0, 0, 1, 1], [], []>} : vector<8x128xf32>, vector<128x128xf32>, vector<8x128xf32> -> vector<8x128xf32>
    %15 = arith.addf %11, %14 : vector<8x128xf32>
    %c1_13 = arith.constant 1 : index
    %c0_14 = arith.constant 0 : index
    %16 = vector.load %arg3[%c1_13, %c0_14] : memref<8x128xf32, #tpu.memory_space<vmem>>, vector<1x128xf32>
    %17 = vector.broadcast %16 : vector<1x128xf32> to vector<8x128xf32>
    %18 = arith.addf %15, %17 : vector<8x128xf32>
    %cst_15 = arith.constant 0.000000e+00 : f32
    %19 = vector.broadcast %cst_15 : f32 to vector<8x128xf32>
    %20 = arith.maximumf %18, %19 : vector<8x128xf32>
    %c3 = arith.constant 3 : index
    %c0_16 = arith.constant 0 : index
    %c0_17 = arith.constant 0 : index
    %21 = vector.load %arg2[%c3, %c0_16, %c0_17] : memref<5x128x128xf32, #tpu.memory_space<vmem>>, vector<1x128x128xf32>
    %22 = vector.shape_cast %21 : vector<1x128x128xf32> to vector<128x128xf32>
    %cst_18 = arith.constant dense<0.000000e+00> : vector<8x128xf32>
    %23 = tpu.matmul %20, %22, %cst_18 {dimension_numbers = #tpu.dot_dimension_numbers<[1], [0], [0], [1], [0, 0, 1, 1], [], []>} : vector<8x128xf32>, vector<128x128xf32>, vector<8x128xf32> -> vector<8x128xf32>
    %c2_19 = arith.constant 2 : index
    %c0_20 = arith.constant 0 : index
    %24 = vector.load %arg3[%c2_19, %c0_20] : memref<8x128xf32, #tpu.memory_space<vmem>>, vector<1x128xf32>
    %25 = vector.broadcast %24 : vector<1x128xf32> to vector<8x128xf32>
    %26 = arith.addf %23, %25 : vector<8x128xf32>
    %cst_21 = arith.constant 0.000000e+00 : f32
    %27 = vector.broadcast %cst_21 : f32 to vector<8x128xf32>
    %28 = arith.maximumf %26, %27 : vector<8x128xf32>
    %c4 = arith.constant 4 : index
    %c0_22 = arith.constant 0 : index
    %c0_23 = arith.constant 0 : index
    %29 = vector.load %arg2[%c4, %c0_22, %c0_23] : memref<5x128x128xf32, #tpu.memory_space<vmem>>, vector<1x128x128xf32>
    %30 = vector.shape_cast %29 : vector<1x128x128xf32> to vector<128x128xf32>
    %cst_24 = arith.constant dense<0.000000e+00> : vector<8x128xf32>
    %31 = tpu.matmul %28, %30, %cst_24 {dimension_numbers = #tpu.dot_dimension_numbers<[1], [0], [0], [1], [0, 0, 1, 1], [], []>} : vector<8x128xf32>, vector<128x128xf32>, vector<8x128xf32> -> vector<8x128xf32>
    %c3_25 = arith.constant 3 : index
    %c0_26 = arith.constant 0 : index
    %32 = vector.load %arg3[%c3_25, %c0_26] : memref<8x128xf32, #tpu.memory_space<vmem>>, vector<1x128xf32>
    %33 = vector.broadcast %32 : vector<1x128xf32> to vector<8x128xf32>
    %34 = arith.addf %31, %33 : vector<8x128xf32>
    %c0_27 = arith.constant 0 : index
    %c0_28 = arith.constant 0 : index
    %35 = vector.load %arg4[%c0_27, %c0_28] : memref<8x128xf32, #tpu.memory_space<vmem>>, vector<8x128xf32>
    tpu.vector_store %arg4[%c0_27, %c0_28], %34 {strides = array<i32>} : memref<8x128xf32, #tpu.memory_space<vmem>>, vector<8x128xf32>,
    return
  }
  func.func @transform_0(%arg0: i32) -> (i32, i32) {
    %c0_i32 = arith.constant 0 : i32
    %c0_i32_0 = arith.constant 0 : i32
    return %arg0, %c0_i32 : i32, i32
  }
  func.func @transform_1(%arg0: i32) -> (i32, i32, i32) {
    %c0_i32 = arith.constant 0 : i32
    %c0_i32_0 = arith.constant 0 : i32
    %c0_i32_1 = arith.constant 0 : i32
    %c0_i32_2 = arith.constant 0 : i32
    return %c0_i32, %c0_i32_0, %c0_i32_1 : i32, i32, i32
  }
  func.func @transform_2(%arg0: i32) -> (i32, i32) {
    %c0_i32 = arith.constant 0 : i32
    %c0_i32_0 = arith.constant 0 : i32
    %c0_i32_1 = arith.constant 0 : i32
    return %c0_i32, %c0_i32_0 : i32, i32
  }
  func.func @transform_3(%arg0: i32) -> (i32, i32) {
    %c0_i32 = arith.constant 0 : i32
    %c0_i32_0 = arith.constant 0 : i32
    return %arg0, %c0_i32 : i32, i32
  }
}

</mosaic_0001>

<bundles_post_ra>
// kernel: forward.1
= control target key start
LH: loop header
LB: loop body
LE: loop exit
PB: predicated region body
PF: predicated region fallthrough
CT: control target
= control target key end

     0   :  { %8 = vsyncpa [#allocation3], 0  ;;  %s907_s12 = smov [#allocation2]   ;;  %s1013_s0 = inlined_call_operand.vmem [shape: f32[8,128], index: 0, kind: input, shape index: {}]   ;;  %s1014_s1 = inlined_call_operand.hbm [shape: f32[5,128,128], index: 1, kind: input, shape index: {}]   ;;  %s1015_s2 = inlined_call_operand.vmem [shape: f32[8,128], index: 2, kind: input, shape index: {}]   ;;  %s1016_s3 = inlined_call_operand.vmem [shape: f32[8,128], index: 3, kind: output, shape index: {}]  }
   0x1   :  { %s16_s13 = sshll.u32 %s907_s12, 4  ;;  %s883_s16 = scalar_lea.hbm %s1014_s1, 10240  ;;  %s17_s13 = int_to_ptr.vmem [resolvable:$true] %s16_s13 }
   0x2   :  { %p884_p0 = scmp.ne.s32.totalorder %s1014_s1, %s883_s16  ;;  %p887_p1 = scmp.lt.u32.totalorder %s883_s16, %s1014_s1 }
   0x4   :  { %p889_p2 = pnand %p887_p1, %p884_p0 }
   0x6   :  { %892 = shalt.err (!%p889_p2)
}
   0x7   :  { %s893_s21 = scalar_lea.vmem %s17_s13, 10240  ;;  %p898_p4 = scmp.lt.s32.totalorder %s17_s13, %s17_s13 }
   0x8   :  { %p894_p3 = scmp.ne.s32.totalorder %s17_s13, %s893_s21  ;;  %p899_p5 = scmp.lt.s32.totalorder %s893_s21, %s893_s21 }
   0xa   :  { %p900_p6 = por %p899_p5, %p898_p4 }
   0xc   :  { %p901_p7 = pnand %p900_p6, %p894_p3 }
   0xe   :  { %904 = shalt.err (!%p901_p7)
}
   0xf   :  { %s908_s22 = smov 128   ;;  %s909_s23 = smov 8  }
  0x10   :  { %22 = dma.hbm_to_vmem [thread:$0]  %s1014_s1, 10240, %s17_s13, [#allocation3], %s908_s22, %s908_s22, %s909_s23  }
  0x11   :  { %905 = dma.done.wait [#allocation3], 10240  }
  0x12   :  { %906 = vsyncadd [#allocation3], 4294957056  ;;  %v910_v0 = vmov 0.0|0.0   ;;  %vm911_vm0 = vmmov 0   ;;  %v912_v1 = vmov 0.0   ;;  %v29_v2 = vld [vmem:[#allocation2] sm:$0xff] }
  0x13   :  { %757 = vmatprep.subr.bf16.mxu0 %v910_v0  ;;  %614 = vmatprep.mubr.msk.f32.mxu0 %vm911_vm0, %v912_v1  ;;  %v30_v3 = vld [vmem:[#allocation2 + $0x8] sm:$0xff]  ;;  %v31_v4 = vld [vmem:[#allocation2 + $0x10] sm:$0xff]  ;;  %v32_v6 = vld [vmem:[#allocation2 + $0x18] sm:$0xff] }
  0x14   :  { %781 = vmatprep.subr.bf16.mxu1 %v910_v0  ;;  %649 = vmatprep.mubr.msk.f32.mxu1 %vm911_vm0, %v912_v1  ;;  %v758_v5 = vpack.c.bf16 %v30_v3, %v29_v2  ;;  %v761_v7 = vpack.c.bf16 %v32_v6, %v31_v4  ;;  %v33_v8 = vld [vmem:[#allocation2 + $0x20] sm:$0xff]  ;;  %v34_v9 = vld [vmem:[#allocation2 + $0x28] sm:$0xff]  ;;  %v141_v14 = vld [vmem:[#allocation2 + $0x110] sm:$0xff] }
  0x15   :  { %v139_v10 = vld [vmem:[#allocation2 + $0x100] sm:$0xff]  ;;  %v140_v11 = vld [vmem:[#allocation2 + $0x108] sm:$0xff]  ;;  %v764_v12 = vpack.c.bf16 %v34_v9, %v33_v8  ;;  %v35_v15 = vld [vmem:[#allocation2 + $0x30] sm:$0xff] }
  0x16   :  { %759 = vmatpush3.bf16.msra.mxu0 %v758_v5  ;;  %v782_v13 = vpack.c.bf16 %v140_v11, %v139_v10  ;;  %v36_v16 = vld [vmem:[#allocation2 + $0x38] sm:$0xff]  ;;  %v143_v19 = vld [vmem:[#allocation2 + $0x120] sm:$0xff]  ;;  %v144_v20 = vld [vmem:[#allocation2 + $0x128] sm:$0xff] }
  0x17   :  { %760 = vmatprep.subr.bf16.mxu0 %v910_v0  ;;  %v142_v17 = vld [vmem:[#allocation2 + $0x118] sm:$0xff]  ;;  %v767_v21 = vpack.c.bf16 %v36_v16, %v35_v15  ;;  %v37_v22 = vld [vmem:[#allocation2 + $0x40] sm:$0xff]  ;;  %v38_v23 = vld [vmem:[#allocation2 + $0x48] sm:$0xff]  ;;  %v788_v24 = vpack.c.bf16 %v144_v20, %v143_v19 }
  0x18   :  { %783 = vmatpush3.bf16.msra.mxu1 %v782_v13  ;;  %v785_v18 = vpack.c.bf16 %v142_v17, %v141_v14  ;;  %v145_v25 = vld [vmem:[#allocation2 + $0x130] sm:$0xff]  ;;  %v146_v26 = vld [vmem:[#allocation2 + $0x138] sm:$0xff]  ;;  %v770_v27 = vpack.c.bf16 %v38_v23, %v37_v22  ;;  %v147_v31 = vld [vmem:[#allocation2 + $0x140] sm:$0xff] }
  0x19   :  { %784 = vmatprep.subr.bf16.mxu1 %v910_v0  ;;  %v39_v28 = vld [vmem:[#allocation2 + $0x50] sm:$0xff]  ;;  %v40_v29 = vld [vmem:[#allocation2 + $0x58] sm:$0xff]  ;;  %v791_v30 = vpack.c.bf16 %v146_v26, %v145_v25  ;;  %v148_v32 = vld [vmem:[#allocation2 + $0x148] sm:$0xff] }
  0x1a   :  { %762 = vmatpush3.bf16.msra.mxu0 %v761_v7  ;;  %v773_v33 = vpack.c.bf16 %v40_v29, %v39_v28  ;;  %v41_v34 = vld [vmem:[#allocation2 + $0x60] sm:$0xff]  ;;  %v42_v35 = vld [vmem:[#allocation2 + $0x68] sm:$0xff]  ;;  %v794_v36 = vpack.c.bf16 %v148_v32, %v147_v31  ;;  %v149_v37 = vld [vmem:[#allocation2 + $0x150] sm:$0xff] }
  0x1b   :  { %763 = vmatprep.subr.bf16.mxu0 %v910_v0  ;;  %v150_v38 = vld [vmem:[#allocation2 + $0x158] sm:$0xff]  ;;  %v776_v39 = vpack.c.bf16 %v42_v35, %v41_v34  ;;  %v43_v40 = vld [vmem:[#allocation2 + $0x70] sm:$0xff]  ;;  %v151_v43 = vld [vmem:[#allocation2 + $0x160] sm:$0xff] }
  0x1c   :  { %786 = vmatpush3.bf16.msra.mxu1 %v785_v18  ;;  %v44_v41 = vld [vmem:[#allocation2 + $0x78] sm:$0xff]  ;;  %v797_v42 = vpack.c.bf16 %v150_v38, %v149_v37  ;;  %v152_v44 = vld [vmem:[#allocation2 + $0x168] sm:$0xff]  ;;  %v122_v46 = vld [vmem:[#allocation2 + $0x80] sm:$0xff] }
  0x1d   :  { %787 = vmatprep.subr.bf16.mxu1 %v910_v0  ;;  %v779_v45 = vpack.c.bf16 %v44_v41, %v43_v40  ;;  %v123_v47 = vld [vmem:[#allocation2 + $0x88] sm:$0xff]  ;;  %v800_v48 = vpack.c.bf16 %v152_v44, %v151_v43  ;;  %v28_v49 = vld [vmem:[%s1013_s0] sm:$0xff]  ;;  %v124_v51 = vld [vmem:[#allocation2 + $0x90] sm:$0xff] }
  0x1e   :  { %765 = vmatpush3.bf16.msra.mxu0 %v764_v12  ;;  %v806_v50 = vpack.c.bf16 %v123_v47, %v122_v46  ;;  %v125_v52 = vld [vmem:[#allocation2 + $0x98] sm:$0xff]  ;;  %v126_v54 = vld [vmem:[#allocation2 + $0xa0] sm:$0xff]  ;;  %v127_v55 = vld [vmem:[#allocation2 + $0xa8] sm:$0xff] }
  0x1f   :  { %766 = vmatprep.subr.bf16.mxu0 %v910_v0  ;;  %v809_v53 = vpack.c.bf16 %v125_v52, %v124_v51  ;;  %v812_v56 = vpack.c.bf16 %v127_v55, %v126_v54  ;;  %v128_v57 = vld [vmem:[#allocation2 + $0xb0] sm:$0xff]  ;;  %v129_v58 = vld [vmem:[#allocation2 + $0xb8] sm:$0xff]  ;;  %v130_v60 = vld [vmem:[#allocation2 + $0xc0] sm:$0xff] }
  0x20   :  { %789 = vmatpush3.bf16.msra.mxu1 %v788_v24  ;;  %v815_v59 = vpack.c.bf16 %v129_v58, %v128_v57  ;;  %v131_v61 = vld [vmem:[#allocation2 + $0xc8] sm:$0xff]  ;;  %v132_v63 = vld [vmem:[#allocation2 + $0xd0] sm:$0xff]  ;;  %v133_v2 = vld [vmem:[#allocation2 + $0xd8] sm:$0xff] }
  0x21   :  { %790 = vmatprep.subr.bf16.mxu1 %v910_v0  ;;  %v818_v62 = vpack.c.bf16 %v131_v61, %v130_v60  ;;  %v821_v3 = vpack.c.bf16 %v133_v2, %v132_v63  ;;  %v134_v4 = vld [vmem:[#allocation2 + $0xe0] sm:$0xff]  ;;  %v135_v5 = vld [vmem:[#allocation2 + $0xe8] sm:$0xff]  ;;  %v136_v7 = vld [vmem:[#allocation2 + $0xf0] sm:$0xff] }
  0x22   :  { %768 = vmatpush3.bf16.msra.mxu0 %v767_v21  ;;  %v824_v6 = vpack.c.bf16 %v135_v5, %v134_v4  ;;  %v137_v8 = vld [vmem:[#allocation2 + $0xf8] sm:$0xff]  ;;  %v153_v10 = vld [vmem:[#allocation2 + $0x170] sm:$0xff]  ;;  %v493_v13 = vld [vmem:[%s1015_s2] ss:$0 sm:$0xff] }
  0x23   :  { %769 = vmatprep.subr.bf16.mxu0 %v910_v0  ;;  %v827_v9 = vpack.c.bf16 %v137_v8, %v136_v7  ;;  %v154_v11 = vld [vmem:[#allocation2 + $0x178] sm:$0xff]  ;;  %v303_v14 = vld [vmem:[#allocation2 + $0x180] sm:$0xff]  ;;  %v304_v15 = vld [vmem:[#allocation2 + $0x188] sm:$0xff] }
  0x24   :  { %792 = vmatpush3.bf16.msra.mxu1 %v791_v30  ;;  %v803_v12 = vpack.c.bf16 %v154_v11, %v153_v10  ;;  %v830_v19 = vpack.c.bf16 %v304_v15, %v303_v14  ;;  %v305_v21 = vld [vmem:[#allocation2 + $0x190] sm:$0xff]  ;;  %v306_v22 = vld [vmem:[#allocation2 + $0x198] sm:$0xff]  ;;  %v307_v24 = vld [vmem:[#allocation2 + $0x1a0] sm:$0xff] }
  0x25   :  { %793 = vmatprep.subr.bf16.mxu1 %v910_v0  ;;  %v833_v23 = vpack.c.bf16 %v306_v22, %v305_v21  ;;  %v308_v25 = vld [vmem:[#allocation2 + $0x1a8] sm:$0xff]  ;;  %v310_v28 = vld [vmem:[#allocation2 + $0x1b8] sm:$0xff]  ;;  %v311_v30 = vld [vmem:[#allocation2 + $0x1c0] sm:$0xff] }
  0x26   :  { %771 = vmatpush3.bf16.msra.mxu0 %v770_v27  ;;  %v836_v26 = vpack.c.bf16 %v308_v25, %v307_v24  ;;  %v309_v27 = vld [vmem:[#allocation2 + $0x1b0] sm:$0xff]  ;;  %v312_v31 = vld [vmem:[#allocation2 + $0x1c8] sm:$0xff]  ;;  %v315_v35 = vld [vmem:[#allocation2 + $0x1e0] sm:$0xff] }
  0x27   :  { %772 = vmatprep.subr.bf16.mxu0 %v910_v0  ;;  %v839_v29 = vpack.c.bf16 %v310_v28, %v309_v27  ;;  %v842_v32 = vpack.c.bf16 %v312_v31, %v311_v30  ;;  %v317_v40 = vld [vmem:[#allocation2 + $0x1f0] sm:$0xff]  ;;  %v318_v41 = vld [vmem:[#allocation2 + $0x1f8] sm:$0xff]  ;;  %v396_v43 = vld [vmem:[#allocation2 + $0x200] sm:$0xff] }
  0x28   :  { %795 = vmatpush3.bf16.msra.mxu1 %v794_v36  ;;  %v316_v36 = vld [vmem:[#allocation2 + $0x1e8] sm:$0xff]  ;;  %v399_v47 = vld [vmem:[#allocation2 + $0x218] sm:$0xff]  ;;  %v402_v52 = vld [vmem:[#allocation2 + $0x230] sm:$0xff] }
  0x29   :  { %796 = vmatprep.subr.bf16.mxu1 %v910_v0  ;;  %v848_v37 = vpack.c.bf16 %v316_v36, %v315_v35  ;;  %v397_v44 = vld [vmem:[#allocation2 + $0x208] sm:$0xff]  ;;  %v404_v55 = vld [vmem:[#allocation2 + $0x240] sm:$0xff]  ;;  %v406_v58 = vld [vmem:[#allocation2 + $0x250] sm:$0xff] }
  0x2a   :  { %774 = vmatpush3.bf16.msra.mxu0 %v773_v33  ;;  %v314_v33 = vld [vmem:[#allocation2 + $0x1d8] sm:$0xff]  ;;  %v854_v46 = vpack.c.bf16 %v397_v44, %v396_v43  ;;  %v408_v61 = vld [vmem:[#allocation2 + $0x260] sm:$0xff]  ;;  %v410_v8 = vld [vmem:[#allocation2 + $0x270] sm:$0xff] }
  0x2b   :  { %775 = vmatprep.subr.bf16.mxu0 %v910_v0  ;;  %v495_v11 = vld [vmem:[%s1015_s2 + $0x2] ss:$0 sm:$0xff]  ;;  %v496_v15 = vld [vmem:[%s1015_s2 + $0x3] ss:$0 sm:$0xff] }
  0x2c   :  { %798 = vmatpush3.bf16.msra.mxu1 %v797_v42  ;;  %v851_v42 = vpack.c.bf16 %v318_v41, %v317_v40 }
  0x2d   :  { %799 = vmatprep.subr.bf16.mxu1 %v910_v0 }
  0x2e   :  { %777 = vmatpush3.bf16.msra.mxu0 %v776_v39 }
  0x2f   :  { %778 = vmatprep.subr.bf16.mxu0 %v910_v0 }
  0x30   :  { %801 = vmatpush3.bf16.msra.mxu1 %v800_v48 }
  0x31   :  { %802 = vmatprep.subr.bf16.mxu1 %v910_v0 }
  0x32   :  { %780 = vmatpush3.bf16.msra.mxu0 %v779_v45  ;;  %v398_v45 = vld [vmem:[#allocation2 + $0x210] sm:$0xff] }
  0x33   :  { %805 = vmatprep.subr.bf16.mxu0 %v910_v0  ;;  %v857_v48 = vpack.c.bf16 %v399_v47, %v398_v45 }
  0x34   :  { %804 = vmatpush3.bf16.msra.mxu1 %v803_v12 }
  0x35   :  { %615 = vmatmul.mubr.f32.vlgmr.msra.gmra.mrb[0].mxu0 %v28_v49  ;;  %829 = vmatprep.subr.bf16.mxu1 %v910_v0 }
  0x36   :  { %807 = vmatpush3.bf16.msra.mxu0 %v806_v50  ;;  %684 = vmatprep.mubr.msk.f32.mxu0 %vm911_vm0, %v912_v1  ;;  %v401_v50 = vld [vmem:[#allocation2 + $0x228] sm:$0xff] }
  0x37   :  { %808 = vmatprep.subr.bf16.mxu0 %v910_v0 }
  0x3a   :  { %810 = vmatpush3.bf16.msra.mxu0 %v809_v53  ;;  %v403_v53 = vld [vmem:[#allocation2 + $0x238] sm:$0xff] }
  0x3b   :  { %811 = vmatprep.subr.bf16.mxu0 %v910_v0  ;;  %v863_v54 = vpack.c.bf16 %v403_v53, %v402_v52 }
  0x3e   :  { %813 = vmatpush3.bf16.msra.mxu0 %v812_v56  ;;  %v405_v56 = vld [vmem:[#allocation2 + $0x248] sm:$0xff] }
  0x3f   :  { %814 = vmatprep.subr.bf16.mxu0 %v910_v0  ;;  %v866_v57 = vpack.c.bf16 %v405_v56, %v404_v55 }
  0x42   :  { %816 = vmatpush3.bf16.msra.mxu0 %v815_v59  ;;  %v407_v59 = vld [vmem:[#allocation2 + $0x258] sm:$0xff] }
  0x43   :  { %817 = vmatprep.subr.bf16.mxu0 %v910_v0  ;;  %v869_v60 = vpack.c.bf16 %v407_v59, %v406_v58 }
  0x46   :  { %819 = vmatpush3.bf16.msra.mxu0 %v818_v62  ;;  %v409_v62 = vld [vmem:[#allocation2 + $0x268] sm:$0xff] }
  0x47   :  { %820 = vmatprep.subr.bf16.mxu0 %v910_v0  ;;  %v872_v63 = vpack.c.bf16 %v409_v62, %v408_v61 }
  0x4a   :  { %822 = vmatpush3.bf16.msra.mxu0 %v821_v3  ;;  %v494_v3 = vld [vmem:[%s1015_s2 + $0x1] ss:$0 sm:$0xff] }
  0x4b   :  { %823 = vmatprep.subr.bf16.mxu0 %v910_v0 }
  0x4e   :  { %825 = vmatpush3.bf16.msra.mxu0 %v824_v6 }
  0x4f   :  { %826 = vmatprep.subr.bf16.mxu0 %v910_v0 }
  0x52   :  { %828 = vmatpush3.bf16.msra.mxu0 %v827_v9  ;;  %v411_v9 = vld [vmem:[#allocation2 + $0x278] sm:$0xff] }
  0x53   :  { %853 = vmatprep.subr.bf16.mxu0 %v910_v0  ;;  %v875_v10 = vpack.c.bf16 %v411_v9, %v410_v8 }
  0x55   :  { %685 = vmatmul.mubr.f32.vlgmr.msra.gmra.mrb[2].mxu0 %v28_v49  ;;  %v400_v49 = vld [vmem:[#allocation2 + $0x220] sm:$0xff] }
  0x56   :  { %754 = vmatprep.mubr.msk.f32.mxu0 %vm911_vm0, %v912_v1  ;;  %855 = vmatpush3.bf16.msra.mxu0 %v854_v46  ;;  %v860_v51 = vpack.c.bf16 %v401_v50, %v400_v49 }
  0x57   :  { %856 = vmatprep.subr.bf16.mxu0 %v910_v0 }
  0x5a   :  { %858 = vmatpush3.bf16.msra.mxu0 %v857_v48 }
  0x5b   :  { %859 = vmatprep.subr.bf16.mxu0 %v910_v0 }
  0x5e   :  { %861 = vmatpush3.bf16.msra.mxu0 %v860_v51 }
  0x5f   :  { %862 = vmatprep.subr.bf16.mxu0 %v910_v0 }
  0x62   :  { %864 = vmatpush3.bf16.msra.mxu0 %v863_v54 }
  0x63   :  { %865 = vmatprep.subr.bf16.mxu0 %v910_v0 }
  0x66   :  { %867 = vmatpush3.bf16.msra.mxu0 %v866_v57 }
  0x67   :  { %868 = vmatprep.subr.bf16.mxu0 %v910_v0 }
  0x6a   :  { %870 = vmatpush3.bf16.msra.mxu0 %v869_v60 }
  0x6b   :  { %871 = vmatprep.subr.bf16.mxu0 %v910_v0 }
  0x6e   :  { %873 = vmatpush3.bf16.msra.mxu0 %v872_v63 }
  0x6f   :  { %874 = vmatprep.subr.bf16.mxu0 %v910_v0 }
  0x72   :  { %876 = vmatpush3.bf16.msra.mxu0 %v875_v10 }
 0x108   :  { %v116_v16 = vpop.f32.mrb[0].mxu0 }
 0x109   :  { %v117_v17 = vadd.f32 %v493_v13, %v116_v16  ;;  %v616_v18 = vpop.f32.mrb[1].mxu0 }
 0x10b   :  { %v120_v20 = vmax.f32 %v117_v17, 0.0 }
 0x10d   :  { %650 = vmatmul.mubr.f32.vlgmr.msra.gmra.mrb[0].mxu1 %v120_v20 }
 0x10e   :  { %831 = vmatpush3.bf16.msra.mxu1 %v830_v19  ;;  %719 = vmatprep.mubr.msk.f32.mxu1 %vm911_vm0, %v912_v1  ;;  %v313_v1 = vld [vmem:[#allocation2 + $0x1d0] sm:$0xff] }
 0x10f   :  { %832 = vmatprep.subr.bf16.mxu1 %v910_v0  ;;  %v845_v34 = vpack.c.bf16 %v314_v33, %v313_v1 }
 0x112   :  { %834 = vmatpush3.bf16.msra.mxu1 %v833_v23 }
 0x113   :  { %835 = vmatprep.subr.bf16.mxu1 %v910_v0 }
 0x116   :  { %837 = vmatpush3.bf16.msra.mxu1 %v836_v26 }
 0x117   :  { %838 = vmatprep.subr.bf16.mxu1 %v910_v0 }
 0x11a   :  { %840 = vmatpush3.bf16.msra.mxu1 %v839_v29 }
 0x11b   :  { %841 = vmatprep.subr.bf16.mxu1 %v910_v0 }
 0x11e   :  { %843 = vmatpush3.bf16.msra.mxu1 %v842_v32 }
 0x11f   :  { %844 = vmatprep.subr.bf16.mxu1 %v910_v0 }
 0x122   :  { %846 = vmatpush3.bf16.msra.mxu1 %v845_v34 }
 0x123   :  { %847 = vmatprep.subr.bf16.mxu1 %v910_v0 }
 0x126   :  { %849 = vmatpush3.bf16.msra.mxu1 %v848_v37 }
 0x127   :  { %850 = vmatprep.subr.bf16.mxu1 %v910_v0 }
 0x128   :  { %v291_v38 = vpop.f32.mrb[2].mxu0 }
 0x129   :  { %v686_v39 = vpop.f32.mrb[3].mxu0 }
 0x12a   :  { %852 = vmatpush3.bf16.msra.mxu1 %v851_v42 }
 0x1e0   :  { %v221_v2 = vpop.f32.mrb[0].mxu1 }
 0x1e1   :  { %v292_v4 = vadd.f32 %v291_v38, %v221_v2  ;;  %v651_v5 = vpop.f32.mrb[1].mxu1 }
 0x1e3   :  { %v300_v6 = vadd.f32 %v494_v3, %v292_v4 }
 0x1e5   :  { %v301_v7 = vmax.f32 %v300_v6, 0.0 }
 0x1e7   :  { %720 = vmatmul.mubr.f32.vlgmr.msra.gmra.mrb[2].mxu1 %v301_v7 }
 0x2ba   :  { %v390_v12 = vpop.f32.mrb[2].mxu1 }
 0x2bb   :  { %v391_v0 = vadd.f32 %v495_v11, %v390_v12  ;;  %v721_v13 = vpop.f32.mrb[3].mxu1 }
 0x2bd   :  { %v394_v14 = vmax.f32 %v391_v0, 0.0 }
 0x2bf   :  { %755 = vmatmul.mubr.f32.vlgmr.msra.gmra.mrb[4].mxu0 %v394_v14 }
 0x392   :  { %v483_v16 = vpop.f32.mrb[4].mxu0 }
 0x393   :  { %v484_v17 = vadd.f32 %v496_v15, %v483_v16  ;;  %v756_v18 = vpop.f32.mrb[5].mxu0 }
 0x395   :  { %487 = vst [vmem:[%s1016_s3] sm:$0xff] %v484_v17 }
 0x396   :  { %492 = vsyncpa [#allocation3], 1 }

</bundles_post_ra>
